<compile_context>
chip_gen: v7x
topology: tpu7x:2x2x1
jax: 0.10.0
libtpu: 0.0.40
codegen_flags: <defaults>
</compile_context>

<pallas_src>
import functools

import jax
import jax.numpy as jnp
from jax.experimental import pallas as pl
from jax.experimental.pallas import tpu as pltpu

NEG_SLOPE = 0.2
BN_EPS = 1e-5


def _round_up(a, b):
    return ((a + b - 1) // b) * b


def _phase1_kernel(p_ref, w_ref, b_ref, y_ref, psum_ref, psq_ref, *,
                   tile_m, m_valid):
    """One M-tile of conv + bias + LeakyReLU, plus per-channel partial sums.

    p_ref : (Kp, TM)       bf16  channel-major im2col tile
    w_ref : (Cout, Kp)     bf16  conv weight (transposed, K zero-padded)
    b_ref : (Cout, 1)      f32   conv bias
    y_ref : (Cout, TM)     f32   pre-BN activations (output)
    psum_ref / psq_ref : (1, Cout, 128) f32  per-tile partial sum / sum-of-sq
    """
    i = pl.program_id(0)
    # bf16 operands, f32 accumulation -> native MXU path.
    acc = jnp.dot(w_ref[...], p_ref[...], preferred_element_type=jnp.float32)
    acc = acc + b_ref[...]                                   # (Cout, TM)
    act = jnp.where(acc > 0, acc, jnp.float32(NEG_SLOPE) * acc)  # LeakyReLU, f32 VPU
    y_ref[...] = act

    # Mask out padded M columns so they don't pollute the batch statistics.
    col = i * tile_m + jax.lax.broadcasted_iota(jnp.int32, act.shape, 1)
    act_m = jnp.where(col < m_valid, act, 0.0)
    s = jnp.sum(act_m, axis=1, keepdims=True)                # (Cout, 1)
    sq = jnp.sum(act_m * act_m, axis=1, keepdims=True)       # (Cout, 1)
    psum_ref[...] = jnp.broadcast_to(s[None], psum_ref.shape)
    psq_ref[...] = jnp.broadcast_to(sq[None], psq_ref.shape)


def _phase2_kernel(y_ref, sc_ref, sh_ref, o_ref):
    """BatchNorm apply: y * scale + shift (scale/shift fold gamma/beta/mean/var)."""
    o_ref[...] = y_ref[...] * sc_ref[...] + sh_ref[...]


def basic_block_conv(x_nchw, w_hwio, bias, gamma, beta, *, tile_m=1024):
    """Forward of BasicBlock_conv.  x_nchw: (N, Cin, H, W) f32 -> (N, Cout, Ho, Wo)."""
    N, Cin, H, W = x_nchw.shape
    KH, KW, _, Cout = w_hwio.shape
    stride, pad = 2, 1
    Ho = (H + 2 * pad - KH) // stride + 1
    Wo = (W + 2 * pad - KW) // stride + 1
    M = N * Ho * Wo
    K = KH * KW * Cin
    Kp = _round_up(K, 16)          # sublane-align the bf16 contraction dim

    # ---- XLA glue: NHWC, pad, channel-major im2col (K, M) ----
    x = jnp.transpose(x_nchw, (0, 2, 3, 1))
    xp = jnp.pad(x, ((0, 0), (pad, pad), (pad, pad), (0, 0)))
    taps = []
    for ky in range(KH):
        for kx in range(KW):
            taps.append(xp[:, ky:ky + stride * (Ho - 1) + 1:stride,
                            kx:kx + stride * (Wo - 1) + 1:stride, :])
    pt = jnp.stack(taps, axis=0)                    # (KH*KW, N, Ho, Wo, Cin)
    pt = jnp.transpose(pt, (0, 4, 1, 2, 3))         # (KH*KW, Cin, N, Ho, Wo)
    pt = pt.reshape(K, M)                           # rows ordered (ky, kx, cin)
    w_t = jnp.transpose(w_hwio.reshape(K, Cout))    # (Cout, K), same K ordering

    # M tiling: lane-dense tiles (multiple of 128); pad M, mask inside kernel.
    TM = _round_up(min(tile_m, _round_up(M, 128)), 128)
    Mp = _round_up(M, TM)
    G = Mp // TM

    pt = jnp.pad(pt, ((0, Kp - K), (0, Mp - M))).astype(jnp.bfloat16)
    w_t = jnp.pad(w_t, ((0, 0), (0, Kp - K))).astype(jnp.bfloat16)
    bias2 = bias.reshape(Cout, 1).astype(jnp.float32)

    f32 = jnp.float32
    cparams = pltpu.CompilerParams(
        dimension_semantics=("parallel",),          # shard M tiles across TCs
        vmem_limit_bytes=32 * 1024 * 1024)          # explicit (v7x-safe) limit

    # -------- phase 1: conv + bias + LeakyReLU + partial sum/sumsq --------
    y_act, psum, psq = pl.pallas_call(
        functools.partial(_phase1_kernel, tile_m=TM, m_valid=M),
        grid=(G,),
        in_specs=[
            pl.BlockSpec((Kp, TM), lambda i: (0, i)),
            pl.BlockSpec((Cout, Kp), lambda i: (0, 0)),
            pl.BlockSpec((Cout, 1), lambda i: (0, 0)),
        ],
        out_specs=(
            pl.BlockSpec((Cout, TM), lambda i: (0, i)),
            pl.BlockSpec((1, Cout, 128), lambda i: (i, 0, 0)),
            pl.BlockSpec((1, Cout, 128), lambda i: (i, 0, 0)),
        ),
        out_shape=(
            jax.ShapeDtypeStruct((Cout, Mp), f32),
            jax.ShapeDtypeStruct((G, Cout, 128), f32),
            jax.ShapeDtypeStruct((G, Cout, 128), f32),
        ),
        compiler_params=cparams,
        cost_estimate=pl.CostEstimate(
            flops=2 * Cout * Kp * Mp,
            transcendentals=0,
            bytes_accessed=(Kp * Mp * 2 + Cout * Kp * 2 + Cout * 4
                            + Cout * Mp * 4 + 2 * G * Cout * 128 * 4)),
    )(pt, w_t, bias2)

    # -------- tiny global reduction + BN scale/shift folding (plain JAX) ----
    cnt = jnp.float32(M)
    mean = jnp.sum(psum[:, :, 0], axis=0) / cnt
    var = jnp.maximum(jnp.sum(psq[:, :, 0], axis=0) / cnt - mean * mean, 0.0)
    inv = jax.lax.rsqrt(var + jnp.float32(BN_EPS))
    scale = (gamma * inv).astype(f32).reshape(Cout, 1)
    shift = (beta - mean * gamma * inv).astype(f32).reshape(Cout, 1)
    # TODO(synk): running_mean/running_var momentum-buffer updates (a training
    # side effect of nn.BatchNorm2d) are not materialized here.

    # -------- phase 2: apply normalization --------
    y_norm = pl.pallas_call(
        _phase2_kernel,
        grid=(G,),
        in_specs=[
            pl.BlockSpec((Cout, TM), lambda i: (0, i)),
            pl.BlockSpec((Cout, 1), lambda i: (0, 0)),
            pl.BlockSpec((Cout, 1), lambda i: (0, 0)),
        ],
        out_specs=pl.BlockSpec((Cout, TM), lambda i: (0, i)),
        out_shape=jax.ShapeDtypeStruct((Cout, Mp), f32),
        compiler_params=cparams,
    )(y_act, scale, shift)

    out = y_norm[:, :M].reshape(Cout, N, Ho, Wo)
    return jnp.transpose(out, (1, 0, 2, 3)).astype(x_nchw.dtype)   # -> NCHW


def reference(x_nchw, w_hwio, bias, gamma, beta):
    """Pure-JAX reference of the same forward pass (for correctness check)."""
    x = jnp.transpose(x_nchw, (0, 2, 3, 1))
    y = jax.lax.conv_general_dilated(
        x, w_hwio, window_strides=(2, 2), padding=((1, 1), (1, 1)),
        dimension_numbers=("NHWC", "HWIO", "NHWC"),
        precision=jax.lax.Precision.HIGHEST)
    y = y + bias
    y = jnp.where(y > 0, y, NEG_SLOPE * y)
    mean = jnp.mean(y, axis=(0, 1, 2), keepdims=True)
    var = jnp.mean((y - mean) ** 2, axis=(0, 1, 2), keepdims=True)
    y = (y - mean) * jax.lax.rsqrt(var + BN_EPS) * gamma + beta
    return jnp.transpose(y, (0, 3, 1, 2))


def _run_case(key, N, dim, H, W, out_planes, tile_m):
    kx, kw, kb, kg, kbeta = jax.random.split(key, 5)
    x = jax.random.normal(kx, (N, dim, H, W), dtype=jnp.float32)
    # Conv weight in HWIO layout (equivalent to PyTorch OIHW after transpose).
    w_hwio = 0.1 * jax.random.normal(kw, (3, 3, dim, out_planes), dtype=jnp.float32)
    bias = 0.1 * jax.random.normal(kb, (out_planes,), dtype=jnp.float32)
    gamma = 1.0 + 0.1 * jax.random.normal(kg, (out_planes,), dtype=jnp.float32)
    beta = 0.1 * jax.random.normal(kbeta, (out_planes,), dtype=jnp.float32)

    fwd = jax.jit(functools.partial(basic_block_conv, tile_m=tile_m))
    out = jax.block_until_ready(fwd(x, w_hwio, bias, gamma, beta))
    ref = reference(x, w_hwio, bias, gamma, beta)

    Ho = (H + 2 - 3) // 2 + 1
    Wo = (W + 2 - 3) // 2 + 1
    assert out.shape == (N, out_planes, Ho, Wo), out.shape
    # Tolerance sized for the bf16-input / f32-accumulate MXU path vs. the
    # f32 HIGHEST-precision reference (outputs are ~unit scale after BN).
    err = float(jnp.max(jnp.abs(out - ref)))
    assert err < 2e-2, err


if __name__ == "__main__":
    key = jax.random.PRNGKey(0)
    k1, k2 = jax.random.split(key)
    # Small shapes consistent with the module: dim=4 -> out_planes=8, k3/s2/p1.
    _run_case(k1, N=2, dim=4, H=16, W=16, out_planes=8, tile_m=128)  # single tile
    _run_case(k2, N=2, dim=4, H=30, W=30, out_planes=8, tile_m=128)  # 4 tiles + M pad/mask
    print("KERNEL_OK")
</pallas_src>

<mosaic_0001>
module attributes {stable_mosaic.version = 11 : i64} {
  func.func @_phase2_kernel(%arg0: i32, %arg1: memref<8x128xf32, #tpu.memory_space<vmem>>, %arg2: memref<8x1xf32, #tpu.memory_space<vmem>>, %arg3: memref<8x1xf32, #tpu.memory_space<vmem>>, %arg4: memref<8x128xf32, #tpu.memory_space<vmem>>) attributes {dimension_semantics = [#tpu.dimension_semantics<parallel>], iteration_bounds = array<i64: 1>, scalar_prefetch = 0 : i64, scratch_operands = 0 : i64, tpu.core_type = #tpu.core_type<tc>, window_params = [{transform_indices = @transform_0, window_bounds = array<i64: 8, 128>}, {pipeline_mode = #tpu.pipeline_mode<synchronous>, transform_indices = @transform_1, window_bounds = array<i64: 8, 1>}, {pipeline_mode = #tpu.pipeline_mode<synchronous>, transform_indices = @transform_2, window_bounds = array<i64: 8, 1>}, {transform_indices = @transform_3, window_bounds = array<i64: 8, 128>}]} {
    %c0 = arith.constant 0 : index
    %c0_0 = arith.constant 0 : index
    %0 = vector.load %arg1[%c0, %c0_0] : memref<8x128xf32, #tpu.memory_space<vmem>>, vector<8x128xf32>
    %c0_1 = arith.constant 0 : index
    %c0_2 = arith.constant 0 : index
    %1 = vector.load %arg2[%c0_1, %c0_2] : memref<8x1xf32, #tpu.memory_space<vmem>>, vector<8x1xf32>
    %2 = vector.broadcast %1 : vector<8x1xf32> to vector<8x128xf32>
    %3 = arith.mulf %0, %2 : vector<8x128xf32>
    %c0_3 = arith.constant 0 : index
    %c0_4 = arith.constant 0 : index
    %4 = vector.load %arg3[%c0_3, %c0_4] : memref<8x1xf32, #tpu.memory_space<vmem>>, vector<8x1xf32>
    %5 = vector.broadcast %4 : vector<8x1xf32> to vector<8x128xf32>
    %6 = arith.addf %3, %5 : vector<8x128xf32>
    %c0_5 = arith.constant 0 : index
    %c0_6 = arith.constant 0 : index
    %7 = vector.load %arg4[%c0_5, %c0_6] : memref<8x128xf32, #tpu.memory_space<vmem>>, vector<8x128xf32>
    tpu.vector_store %arg4[%c0_5, %c0_6], %6 {strides = array<i32>} : memref<8x128xf32, #tpu.memory_space<vmem>>, vector<8x128xf32>,
    return
  }
  func.func @transform_0(%arg0: i32) -> (i32, i32) {
    %c0_i32 = arith.constant 0 : i32
    %c0_i32_0 = arith.constant 0 : i32
    return %c0_i32, %arg0 : i32, i32
  }
  func.func @transform_1(%arg0: i32) -> (i32, i32) {
    %c0_i32 = arith.constant 0 : i32
    %c0_i32_0 = arith.constant 0 : i32
    %c0_i32_1 = arith.constant 0 : i32
    return %c0_i32, %c0_i32_0 : i32, i32
  }
  func.func @transform_2(%arg0: i32) -> (i32, i32) {
    %c0_i32 = arith.constant 0 : i32
    %c0_i32_0 = arith.constant 0 : i32
    %c0_i32_1 = arith.constant 0 : i32
    return %c0_i32, %c0_i32_0 : i32, i32
  }
  func.func @transform_3(%arg0: i32) -> (i32, i32) {
    %c0_i32 = arith.constant 0 : i32
    %c0_i32_0 = arith.constant 0 : i32
    return %c0_i32, %arg0 : i32, i32
  }
}

module attributes {stable_mosaic.version = 11 : i64} {
  func.func @_phase1_kernel(%arg0: i32, %arg1: memref<48x128xbf16, #tpu.memory_space<vmem>>, %arg2: memref<8x48xbf16, #tpu.memory_space<vmem>>, %arg3: memref<8x1xf32, #tpu.memory_space<vmem>>, %arg4: memref<8x128xf32, #tpu.memory_space<vmem>>, %arg5: memref<1x8x128xf32, #tpu.memory_space<vmem>>, %arg6: memref<1x8x128xf32, #tpu.memory_space<vmem>>) attributes {dimension_semantics = [#tpu.dimension_semantics<parallel>], iteration_bounds = array<i64: 1>, scalar_prefetch = 0 : i64, scratch_operands = 0 : i64, tpu.core_type = #tpu.core_type<tc>, window_params = [{transform_indices = @transform_0, window_bounds = array<i64: 48, 128>}, {pipeline_mode = #tpu.pipeline_mode<synchronous>, transform_indices = @transform_1, window_bounds = array<i64: 8, 48>}, {pipeline_mode = #tpu.pipeline_mode<synchronous>, transform_indices = @transform_2, window_bounds = array<i64: 8, 1>}, {transform_indices = @transform_3, window_bounds = array<i64: 8, 128>}, {transform_indices = @transform_4, window_bounds = array<i64: 1, 8, 128>}, {transform_indices = @transform_5, window_bounds = array<i64: 1, 8, 128>}]} {
    %c0 = arith.constant 0 : index
    %c0_0 = arith.constant 0 : index
    %0 = vector.load %arg2[%c0, %c0_0] : memref<8x48xbf16, #tpu.memory_space<vmem>>, vector<8x48xbf16>
    %c0_1 = arith.constant 0 : index
    %c0_2 = arith.constant 0 : index
    %1 = vector.load %arg1[%c0_1, %c0_2] : memref<48x128xbf16, #tpu.memory_space<vmem>>, vector<48x128xbf16>
    %cst = arith.constant dense<0.000000e+00> : vector<8x128xf32>
    %2 = tpu.matmul %0, %1, %cst {dimension_numbers = #tpu.dot_dimension_numbers<[1], [0], [0], [1], [0, 0, 1, 1], [], []>} : vector<8x48xbf16>, vector<48x128xbf16>, vector<8x128xf32> -> vector<8x128xf32>
    %c0_3 = arith.constant 0 : index
    %c0_4 = arith.constant 0 : index
    %3 = vector.load %arg3[%c0_3, %c0_4] : memref<8x1xf32, #tpu.memory_space<vmem>>, vector<8x1xf32>
    %4 = vector.broadcast %3 : vector<8x1xf32> to vector<8x128xf32>
    %5 = arith.addf %2, %4 : vector<8x128xf32>
    %cst_5 = arith.constant 0.000000e+00 : f32
    %6 = vector.broadcast %cst_5 : f32 to vector<8x128xf32>
    %7 = arith.cmpf ogt, %5, %6 : vector<8x128xf32>
    %cst_6 = arith.constant 2.000000e-01 : f32
    %8 = vector.broadcast %cst_6 : f32 to vector<8x128xf32>
    %9 = arith.mulf %8, %5 : vector<8x128xf32>
    %10 = arith.select %7, %5, %9 : vector<8x128xi1>, vector<8x128xf32>
    %c0_7 = arith.constant 0 : index
    %c0_8 = arith.constant 0 : index
    %11 = vector.load %arg4[%c0_7, %c0_8] : memref<8x128xf32, #tpu.memory_space<vmem>>, vector<8x128xf32>
    tpu.vector_store %arg4[%c0_7, %c0_8], %10 {strides = array<i32>} : memref<8x128xf32, #tpu.memory_space<vmem>>, vector<8x128xf32>,
    %c128_i32 = arith.constant 128 : i32
    %12 = arith.muli %arg0, %c128_i32 : i32
    %13 = tpu.iota {dimensions = array<i32: 1>} : vector<8x128xi32>
    %14 = vector.broadcast %12 : i32 to vector<8x128xi32>
    %15 = arith.addi %14, %13 : vector<8x128xi32>
    %c128_i32_9 = arith.constant 128 : i32
    %16 = vector.broadcast %c128_i32_9 : i32 to vector<8x128xi32>
    %17 = arith.cmpi slt, %15, %16 : vector<8x128xi32>
    %cst_10 = arith.constant 0.000000e+00 : f32
    %18 = vector.broadcast %cst_10 : f32 to vector<8x128xf32>
    %19 = arith.select %17, %10, %18 : vector<8x128xi1>, vector<8x128xf32>
    %cst_11 = arith.constant dense<0.000000e+00> : vector<8xf32>
    %20 = vector.multi_reduction <add>, %19, %cst_11 [1] : vector<8x128xf32> to vector<8xf32>
    %21 = vector.shape_cast %20 : vector<8xf32> to vector<8x1xf32>
    %22 = arith.mulf %19, %19 : vector<8x128xf32>
    %cst_12 = arith.constant dense<0.000000e+00> : vector<8xf32>
    %23 = vector.multi_reduction <add>, %22, %cst_12 [1] : vector<8x128xf32> to vector<8xf32>
    %24 = vector.shape_cast %23 : vector<8xf32> to vector<8x1xf32>
    %25 = vector.shape_cast %21 : vector<8x1xf32> to vector<1x8x1xf32>
    %26 = vector.shape_cast %25 : vector<1x8x1xf32> to vector<1x8x1xf32>
    %27 = vector.broadcast %26 : vector<1x8x1xf32> to vector<1x8x128xf32>
    %c0_13 = arith.constant 0 : index
    %c0_14 = arith.constant 0 : index
    %c0_15 = arith.constant 0 : index
    %28 = vector.load %arg5[%c0_13, %c0_14, %c0_15] : memref<1x8x128xf32, #tpu.memory_space<vmem>>, vector<1x8x128xf32>
    tpu.vector_store %arg5[%c0_13, %c0_14, %c0_15], %27 {strides = array<i32>} : memref<1x8x128xf32, #tpu.memory_space<vmem>>, vector<1x8x128xf32>,
    %29 = vector.shape_cast %24 : vector<8x1xf32> to vector<1x8x1xf32>
    %30 = vector.shape_cast %29 : vector<1x8x1xf32> to vector<1x8x1xf32>
    %31 = vector.broadcast %30 : vector<1x8x1xf32> to vector<1x8x128xf32>
    %c0_16 = arith.constant 0 : index
    %c0_17 = arith.constant 0 : index
    %c0_18 = arith.constant 0 : index
    %32 = vector.load %arg6[%c0_16, %c0_17, %c0_18] : memref<1x8x128xf32, #tpu.memory_space<vmem>>, vector<1x8x128xf32>
    tpu.vector_store %arg6[%c0_16, %c0_17, %c0_18], %31 {strides = array<i32>} : memref<1x8x128xf32, #tpu.memory_space<vmem>>, vector<1x8x128xf32>,
    return
  }
  func.func @transform_0(%arg0: i32) -> (i32, i32) {
    %c0_i32 = arith.constant 0 : i32
    %c0_i32_0 = arith.constant 0 : i32
    return %c0_i32, %arg0 : i32, i32
  }
  func.func @transform_1(%arg0: i32) -> (i32, i32) {
    %c0_i32 = arith.constant 0 : i32
    %c0_i32_0 = arith.constant 0 : i32
    %c0_i32_1 = arith.constant 0 : i32
    return %c0_i32, %c0_i32_0 : i32, i32
  }
  func.func @transform_2(%arg0: i32) -> (i32, i32) {
    %c0_i32 = arith.constant 0 : i32
    %c0_i32_0 = arith.constant 0 : i32
    %c0_i32_1 = arith.constant 0 : i32
    return %c0_i32, %c0_i32_0 : i32, i32
  }
  func.func @transform_3(%arg0: i32) -> (i32, i32) {
    %c0_i32 = arith.constant 0 : i32
    %c0_i32_0 = arith.constant 0 : i32
    return %c0_i32, %arg0 : i32, i32
  }
  func.func @transform_4(%arg0: i32) -> (i32, i32, i32) {
    %c0_i32 = arith.constant 0 : i32
    %c0_i32_0 = arith.constant 0 : i32
    %c0_i32_1 = arith.constant 0 : i32
    return %arg0, %c0_i32, %c0_i32_0 : i32, i32, i32
  }
  func.func @transform_5(%arg0: i32) -> (i32, i32, i32) {
    %c0_i32 = arith.constant 0 : i32
    %c0_i32_0 = arith.constant 0 : i32
    %c0_i32_1 = arith.constant 0 : i32
    return %arg0, %c0_i32, %c0_i32_0 : i32, i32, i32
  }
}

</mosaic_0001>

<bundles_post_ra>
// kernel: basic_block_conv.3
= control target key start
LH: loop header
LB: loop body
LE: loop exit
PB: predicated region body
PF: predicated region fallthrough
CT: control target
= control target key end

     0   :  { %v36_v0 = vmov 0   ;;  %s69_s1 = inlined_call_operand.vmem [shape: f32[8,1], index: 1, kind: input, shape index: {}]   ;;  %s70_s2 = inlined_call_operand.vmem [shape: f32[8,1], index: 2, kind: input, shape index: {}]   ;;  %s71_s0 = inlined_call_operand.vmem [shape: f32[8,128], index: 0, kind: input, shape index: {}]   ;;  %s72_s3 = inlined_call_operand.vmem [shape: f32[8,128], index: 3, kind: output, shape index: {}]  }
   0x1   :  { %35 = vset.pattern.permute.xlu0 %v36_v0  ;;  %v15_v1 = vld [vmem:[%s69_s1] sm:$0xff] }
   0x2   :  { %18 = vperm.xlu0 %35, %v15_v1   ;;  %v22_v2 = vld [vmem:[%s70_s2] sm:$0xff] }
   0x3   :  { %v14_v4 = vld [vmem:[%s71_s0] sm:$0xff] }
   0x6   :  { %25 = vperm.xlu0 %35, %v22_v2  }
  0x81   :  { %v19_v3 = vpop.permute.xlu0 %18 }
  0x82   :  { %v21_v5 = vmul.f32 %v19_v3, %v14_v4 }
  0x85   :  { %v26_v6 = vpop.permute.xlu0 %25 }
  0x86   :  { %v28_v7 = vadd.f32 %v26_v6, %v21_v5 }
  0x88   :  { %29 = vst [vmem:[%s72_s3] sm:$0xff] %v28_v7 }

// kernel: basic_block_conv.2
= control target key start
LH: loop header
LB: loop body
LE: loop exit
PB: predicated region body
PF: predicated region fallthrough
CT: control target
= control target key end

     0   :  { %v148_v0 = vmov 0.0   ;;  %vm149_vm0 = vmmov 0   ;;  %v150_v2 = vmov 0   ;;  %vm49_vm1 = vcmask 392192   ;;  %s205_s0 = inlined_call_operand.vmem [shape: bf16[48,128], index: 0, kind: input, shape index: {}]   ;;  %s206_s2 = inlined_call_operand.vmem [shape: f32[8,1], index: 2, kind: input, shape index: {}]   ;;  %s207_s1 = inlined_call_operand.vmem [shape: bf16[8,48], index: 1, kind: input, shape index: {}]   ;;  %s208_s3 = inlined_call_operand.vmem [shape: f32[8,128], index: 3, kind: output, shape index: {0}]   ;;  %s209_s4 = inlined_call_operand.vmem [shape: f32[1,8,128], index: 4, kind: output, shape index: {1}]   ;;  %s210_s5 = inlined_call_operand.vmem [shape: f32[1,8,128], index: 5, kind: output, shape index: {2}]  }
   0x1   :  { %131 = vmatprep.subr.bf16.mxu0 %v148_v0  ;;  %v145_v1 = vld [vmem:[%s205_s0] sm:$0xff]   ;;  %137 = vmatprep.mubr.msk.bf16.mxu0 %vm149_vm0, %v148_v0  ;;  %v146_v3 = vld [vmem:[%s205_s0 + $0x8] sm:$0xff]   ;;  %v147_v5 = vld [vmem:[%s205_s0 + $0x10] sm:$0xff]  }
   0x2   :  { %144 = vset.pattern.permute.xlu0 %v150_v2  ;;  %132 = vmatpush3.bf16.msra.mxu0 %v145_v1  ;;  %v25_v4 = vld [vmem:[%s206_s2] sm:$0xff] }
   0x3   :  { %133 = vmatprep.subr.bf16.mxu0 %v148_v0  ;;  %28 = vperm.xlu0 %144, %v25_v4   ;;  %v18_v6 = vld [vmem:[%s207_s1] sm:$0xf] }
   0x6   :  { %134 = vmatpush3.bf16.msra.mxu0 %v146_v3 }
   0x7   :  { %135 = vmatprep.subr.bf16.mxu0 %v148_v0 }
   0xa   :  { %136 = vmatpush3.bf16.msra.mxu0 %v147_v5 }
   0xd   :  { %138 = vmatmul.mubr.msk.bf16.vlgmr.msra.gmra.mrb[0].mxu0 %vm49_vm1, %v18_v6 }
  0x82   :  { %v29_v7 = vpop.permute.xlu0 %28 }
  0xe0   :  { %v87_v8 = vpop.f32.mrb[0].mxu0 }
  0xe1   :  { %v88_v9 = vadd.f32 %v87_v8, %v29_v7  ;;  %v139_v10 = vpop.f32.mrb[1].mxu0 }
  0xe2   :  { %v90_v11 = vpop.f32.mrb[2].mxu0 }
  0xe3   :  { %v94_v12 = vmul.f32 0.2, %v88_v9  ;;  %v140_v13 = vpop.f32.mrb[3].mxu0  ;;  %vm93_vm2 = vcmp.gt.f32.partialorder %v88_v9, 0.0 }
  0xe5   :  { %v95_v14 = vsel %vm93_vm2, %v88_v9, %v94_v12 }
  0xe6   :  { %104 = vadd.xlane.f32.xlu0 %v95_v14  ;;  %96 = vst [vmem:[%s208_s3] sm:$0xff] %v95_v14  ;;  %v106_v15 = vmul.f32 %v95_v14, %v95_v14 }
  0xe8   :  { %107 = vadd.xlane.f32.xlu1 %v106_v15 }
 0x173   :  { %v105_v16 = vpop.xlane.xlu0 %104 }
 0x174   :  { %109 = vst [vmem:[%s209_s4] sm:$0xff] %v105_v16 }
 0x175   :  { %v108_v17 = vpop.xlane.xlu1 %107 }
 0x176   :  { %110 = vst [vmem:[%s210_s5] sm:$0xff] %v108_v17 }

</bundles_post_ra>
